<compile_context>
chip_gen: v5e
topology: v5e:2x2
jax: 0.10.0
libtpu: 0.0.40
codegen_flags: <defaults>
</compile_context>

<pallas_src>
import jax
import jax.numpy as jnp
from jax.experimental import pallas as pl
from jax.experimental.pallas import tpu as pltpu

_LANE = 128
_SUBLANE = 8


def _gelu2_kernel(x_ref, o_ref):
    xf = x_ref[...].astype(jnp.float32)
    y = xf * jax.nn.sigmoid(1.702 * xf)
    o_ref[...] = y.astype(o_ref.dtype)


def gelu2(x, *, target_block_bytes=2 * 1024 * 1024):
    """Elementwise GELU2 (x * sigmoid(1.702 * x)) for any shape/dtype."""
    orig_shape = x.shape
    orig_dtype = x.dtype
    n = x.size
    itemsize = jnp.dtype(orig_dtype).itemsize

    # Widest lane-dense slab width (multiple of 128) that divides n exactly
    # -> pure reshape, no HBM pad/slice round-trips.
    width = None
    for w in (4096, 2048, 1024, 512, 256, 128):
        if n % w == 0:
            width = w
            break

    if width is not None:
        rows = n // width
        x2d = x.reshape(rows, width)
        padded = False
    else:
        # Fallback for non-128-aligned sizes: pad flat array up to the lane
        # boundary (tiny), slice back off at the end.
        width = _LANE
        rows = pl.cdiv(n, _LANE)
        pad = rows * _LANE - n
        x2d = jnp.pad(x.reshape(-1), (0, pad)).reshape(rows, width)
        padded = True

    # Block: as many rows as fit in ~target_block_bytes.  Row-block is either
    # the full extent or a multiple of 8 (sublane-aligned); width is the full
    # (128-aligned) slab width, so the (8,128) constraint is always satisfied.
    max_rows = max(1, target_block_bytes // (width * itemsize))
    if rows <= max_rows:
        block_rows = rows
        grid = (1,)
    else:
        block_rows = max(_SUBLANE, (max_rows // _SUBLANE) * _SUBLANE)
        grid = (pl.cdiv(rows, block_rows),)

    cost = pl.CostEstimate(
        flops=4 * n,
        transcendentals=n,                    # one exp per element (sigmoid)
        bytes_accessed=2 * n * itemsize,      # read + write, mem-bound
    )

    out = pl.pallas_call(
        _gelu2_kernel,
        out_shape=jax.ShapeDtypeStruct((rows, width), orig_dtype),
        grid_spec=pltpu.PrefetchScalarGridSpec(
            num_scalar_prefetch=0,
            grid=grid,
            in_specs=[pl.BlockSpec((block_rows, width), lambda i: (i, 0))],
            out_specs=pl.BlockSpec((block_rows, width), lambda i: (i, 0)),
        ),
        compiler_params=pltpu.CompilerParams(
            dimension_semantics=("parallel",)),
        cost_estimate=cost,
    )(x2d)

    if padded:
        return out.reshape(-1)[:n].reshape(orig_shape)
    return out.reshape(orig_shape)


def gelu2_ref(x):
    xf = x.astype(jnp.float32)
    return (xf * jax.nn.sigmoid(1.702 * xf)).astype(x.dtype)


if __name__ == "__main__":
    key = jax.random.PRNGKey(0)

    # NCHW activation shape typical for the diffusion model (128-aligned path).
    x = jax.random.normal(key, (2, 4, 16, 16), dtype=jnp.float32)
    y = gelu2(x)
    jax.block_until_ready(y)
    y_ref = gelu2_ref(x)
    assert y.shape == x.shape and y.dtype == x.dtype
    assert jnp.allclose(y, y_ref, atol=1e-6, rtol=1e-6)

    # Non-128-aligned size exercises the pad fallback path.
    x2 = jax.random.normal(jax.random.PRNGKey(1), (3, 5, 7), dtype=jnp.float32)
    y2 = gelu2(x2)
    jax.block_until_ready(y2)
    assert y2.shape == x2.shape and y2.dtype == x2.dtype
    assert jnp.allclose(y2, gelu2_ref(x2), atol=1e-6, rtol=1e-6)

    # bf16 path (compute in f32, cast back).
    x3 = jax.random.normal(jax.random.PRNGKey(2), (2, 4, 16, 16),
                           dtype=jnp.bfloat16)
    y3 = gelu2(x3)
    jax.block_until_ready(y3)
    assert y3.shape == x3.shape and y3.dtype == x3.dtype
    assert jnp.allclose(y3.astype(jnp.float32),
                        gelu2_ref(x3).astype(jnp.float32),
                        atol=2e-2, rtol=2e-2)

    print("KERNEL_OK")
</pallas_src>

<mosaic_0001>
module attributes {stable_mosaic.version = 11 : i64} {
  func.func @_gelu2_kernel(%arg0: i32, %arg1: memref<1x2048xf32, #tpu.memory_space<vmem>>, %arg2: memref<1x2048xf32, #tpu.memory_space<vmem>>) attributes {dimension_semantics = [#tpu.dimension_semantics<parallel>], iteration_bounds = array<i64: 1>, scalar_prefetch = 0 : i64, scratch_operands = 0 : i64, tpu.core_type = #tpu.core_type<tc>, window_params = [{transform_indices = @transform_0, window_bounds = array<i64: 1, 2048>}, {transform_indices = @transform_1, window_bounds = array<i64: 1, 2048>}]} {
    %c0 = arith.constant 0 : index
    %c0_0 = arith.constant 0 : index
    %0 = vector.load %arg1[%c0, %c0_0] : memref<1x2048xf32, #tpu.memory_space<vmem>>, vector<1x2048xf32>
    %cst = arith.constant 1.702000e+00 : f32
    %1 = vector.broadcast %cst : f32 to vector<1x2048xf32>
    %2 = arith.mulf %1, %0 : vector<1x2048xf32>
    %3 = arith.negf %2 : vector<1x2048xf32>
    %4 = math.exp %3 : vector<1x2048xf32>
    %cst_1 = arith.constant 1.000000e+00 : f32
    %5 = vector.broadcast %cst_1 : f32 to vector<1x2048xf32>
    %6 = arith.addf %5, %4 : vector<1x2048xf32>
    %7 = arith.divf %5, %6 : vector<1x2048xf32>
    %8 = arith.mulf %0, %7 : vector<1x2048xf32>
    %c0_2 = arith.constant 0 : index
    %c0_3 = arith.constant 0 : index
    %9 = vector.load %arg2[%c0_2, %c0_3] : memref<1x2048xf32, #tpu.memory_space<vmem>>, vector<1x2048xf32>
    tpu.vector_store %arg2[%c0_2, %c0_3], %8 {strides = array<i32>} : memref<1x2048xf32, #tpu.memory_space<vmem>>, vector<1x2048xf32>,
    return
  }
  func.func @transform_0(%arg0: i32) -> (i32, i32) {
    %c0_i32 = arith.constant 0 : i32
    %c0_i32_0 = arith.constant 0 : i32
    return %arg0, %c0_i32 : i32, i32
  }
  func.func @transform_1(%arg0: i32) -> (i32, i32) {
    %c0_i32 = arith.constant 0 : i32
    %c0_i32_0 = arith.constant 0 : i32
    return %arg0, %c0_i32 : i32, i32
  }
}

</mosaic_0001>

<bundles_post_ra>
// kernel: tpu_custom_call.1
= control target key start
LH: loop header
LB: loop body
LE: loop exit
PB: predicated region body
PF: predicated region fallthrough
CT: control target
= control target key end

     0   :  { %6 = vsyncpa [#allocation3], 0  ;;  %s168_s0 = inlined_call_operand.hbm [shape: f32[1,2048], index: 0, kind: input, shape index: {}]   ;;  %s169_s1 = inlined_call_operand.hbm [shape: f32[1,2048], index: 1, kind: output, shape index: {}]  }
   0x1   :  { %7 = vsyncpa [#allocation4], 0  ;;  %s13_s8 = sshll.u32 %s168_s0, 4  ;;  %s150_s9 = smov [#allocation2]   ;;  %s14_s8 = int_to_ptr.hbm [resolvable:$true] %s13_s8 }
   0x2   :  { %s15_s10 = sshll.u32 %s150_s9, 4  ;;  %s16_s10 = int_to_ptr.vmem [resolvable:$true] %s15_s10 }
   0x3   :  { %18 = dma.hbm_to_vmem [thread:$0]  %s14_s8, 256, %s16_s10, [#allocation3]  }
   0x4   :  { %146 = dma.done.wait [#allocation3], 256  }
   0x5   :  { %147 = vsyncadd [#allocation3], 4294967040  ;;  %v23_v0 = vld [vmem:[#allocation2] sm:$0xff]  ;;  %v24_v1 = vld [vmem:[#allocation2 + $0x8] sm:$0xff]  ;;  %s151_s0 = smov [#allocation5]   ;;  %s76_s14 = sshll.u32 %s169_s1, 4  ;;  %s77_s14 = int_to_ptr.hbm [resolvable:$true] %s76_s14 }
   0x6   :  { %v86_v2 = vmul.f32 -1.702, %v23_v0  ;;  %v87_v3 = vmul.f32 -1.702, %v24_v1  ;;  %s74_s11 = sshll.u32 %s151_s0, 4  ;;  %s75_s11 = int_to_ptr.vmem [resolvable:$true] %s74_s11 }
   0x8   :  { %v29_v4 = vmul.f32 1.442695, %v86_v2  ;;  %v31_v5 = vmul.f32 1.442695, %v87_v3 }
   0xa   :  { %90 = vpow2.f32 %v29_v4 }
   0xb   :  { %92 = vpow2.f32 %v31_v5 }
  0x10   :  { %v91_v6 = vpop.eup %90 }
  0x11   :  { %v93_v7 = vpop.eup %92  ;;  %v33_v8 = vadd.f32 1.0, %v91_v6 }
  0x12   :  { %v34_v9 = vadd.f32 1.0, %v93_v7 }
  0x13   :  { %94 = vrcp.f32 %v33_v8  ;;  %vm40_vm0 = vweird.f32 %v33_v8  ;;  %v46_v13 = vand.u32 2147483648, %v33_v8  ;;  %v44_v16 = vand.u32 2147483647, %v33_v8 }
  0x14   :  { %96 = vrcp.f32 %v34_v9  ;;  %v61_v17 = vand.u32 2147483648, %v34_v9  ;;  %vm55_vm2 = vweird.f32 %v34_v9  ;;  %v59_v19 = vand.u32 2147483647, %v34_v9 }
  0x15   :  { %v47_v21 = vor.u32 1.1754944e-38, %v46_v13  ;;  %vm45_vm5 = vcmp.eq.f32.partialorder %v44_v16, 8.507059e+37 }
  0x16   :  { %v62_v24 = vor.u32 1.1754944e-38, %v61_v17  ;;  %vm60_vm7 = vcmp.eq.f32.partialorder %v59_v19, 8.507059e+37 }
  0x19   :  { %v95_v10 = vpop.eup %94 }
  0x1a   :  { %v97_v11 = vpop.eup %96  ;;  %v36_v12 = vmul.f32 %v95_v10, %v33_v8  ;;  %vm41_vm1 = vweird.f32 %v95_v10 }
  0x1b   :  { %v51_v14 = vmul.f32 %v97_v11, %v34_v9  ;;  %vm56_vm3 = vweird.f32 %v97_v11  ;;  %vm42_vm4 = vmor %vm40_vm0, %vm41_vm1 }
  0x1c   :  { %v37_v15 = vsub.f32 1.0, %v36_v12  ;;  %vm57_vm6 = vmor %vm55_vm2, %vm56_vm3 }
  0x1d   :  { %v52_v18 = vsub.f32 1.0, %v51_v14 }
  0x1e   :  { %v38_v20 = vmul.f32 %v95_v10, %v37_v15 }
  0x1f   :  { %v53_v22 = vmul.f32 %v97_v11, %v52_v18 }
  0x20   :  { %v39_v23 = vadd.f32 %v95_v10, %v38_v20 }
  0x21   :  { %v54_v25 = vadd.f32 %v97_v11, %v53_v22 }
  0x22   :  { %v43_v26 = vsel %vm42_vm4, %v95_v10, %v39_v23 }
  0x23   :  { %v48_v27 = vsel %vm45_vm5, %v47_v21, %v43_v26  ;;  %v58_v28 = vsel %vm57_vm6, %v97_v11, %v54_v25 }
  0x24   :  { %v65_v29 = vmul.f32 %v48_v27, %v23_v0  ;;  %v63_v30 = vsel %vm60_vm7, %v62_v24, %v58_v28 }
  0x25   :  { %v66_v31 = vmul.f32 %v63_v30, %v24_v1 }
  0x26   :  { %67 = vst [vmem:[#allocation5] sm:$0xff] %v65_v29 }
  0x27   :  { %68 = vst [vmem:[#allocation5 + $0x8] sm:$0xff] %v66_v31 }
  0x28   :  { %79 = dma.vmem_to_hbm [thread:$0]  %s75_s11, 256, %s77_s14, [#allocation4]  }
  0x29   :  { %148 = dma.done.wait [#allocation4], 256  }
  0x2a   :  { %149 = vsyncadd [#allocation4], 4294967040 }
  0x2b   :  { %84 = vsyncpa [#allocation3], 1 }
  0x2c   :  { %85 = vsyncpa [#allocation4], 1 }

</bundles_post_ra>
